<compile_context>
chip_gen: v7x
topology: tpu7x:2x2x1
jax: 0.10.0
libtpu: 0.0.40
codegen_flags: <defaults>
</compile_context>

<pallas_src>
import jax
import jax.numpy as jnp
from jax.experimental import pallas as pl
from jax.experimental.pallas import tpu as pltpu


def _cdown2_gemm_kernel(pr_ref, pi_ref, wt_ref, wb_ref, b_ref, o_ref, acc_ref):
    # One fused complex-GEMM tile: (TM,TK)@(TK,Cpad) x2, f32 accumulation over K.
    k = pl.program_id(1)

    @pl.when(k == 0)
    def _init():
        acc_ref[...] = jnp.zeros_like(acc_ref)

    acc_ref[...] += (
        jnp.dot(pr_ref[...], wt_ref[...], preferred_element_type=jnp.float32)
        + jnp.dot(pi_ref[...], wb_ref[...], preferred_element_type=jnp.float32))

    @pl.when(k == pl.num_programs(1) - 1)
    def _finalize():
        o_ref[...] = (acc_ref[...] + b_ref[...]).astype(o_ref.dtype)


def _round_up(x, m):
    return (x + m - 1) // m * m


def _im2col(x_nhwc, ksize, stride, pad, k_pad_to):
    """(N,H,W,C) -> (N*Ho*Wo, k_pad_to) patches, feature order (kh, kw, c).

    Zero columns up to k_pad_to are appended inside the same concatenate so the
    padded patch matrix is materialized in one XLA pass (no extra jnp.pad pass).
    """
    N, H, W, C = x_nhwc.shape
    xp = jnp.pad(x_nhwc, ((0, 0), (pad, pad), (pad, pad), (0, 0)))
    Ho = (H + 2 * pad - ksize) // stride + 1
    Wo = (W + 2 * pad - ksize) // stride + 1
    cols = []
    for kh in range(ksize):
        for kw in range(ksize):
            cols.append(xp[:, kh:kh + stride * Ho:stride,
                           kw:kw + stride * Wo:stride, :])
    kdim = ksize * ksize * C
    if k_pad_to > kdim:
        cols.append(jnp.zeros((N, Ho, Wo, k_pad_to - kdim), x_nhwc.dtype))
    patches = jnp.concatenate(cols, axis=-1)               # (N, Ho, Wo, k_pad_to)
    return patches.reshape(N * Ho * Wo, k_pad_to), Ho, Wo


def cdown2_forward(x, wr, wi, br, bi, *, stride=2, pad=1,
                   compute_dtype=jnp.bfloat16, tile_m=1024,
                   output_format="nchw_complex"):
    """ComplexConv2d(Cin, Cout, 3, stride=2, padding=1) forward.

    x: complex64 (N, Cin, H, W); wr/wi: (Cout, Cin, 3, 3); br/bi: (Cout,).

    NOTE: with the default compute_dtype=bf16 both the *activations* and the
    weights are cast to bf16 before the GEMM (f32 MXU accumulation); pass
    compute_dtype=jnp.float32 for the exact path.

    output_format:
      "nchw_complex": complex64 (N, Cout, Ho, Wo)   (matches the PyTorch module)
      "nhwc_packed" : compute_dtype (N, Ho, Wo, 2*Cout), last axis = [real|imag]
                      (skips the transpose + complex-combine epilogue passes).
    """
    N, Cin, H, W = x.shape
    Cout, _, K, _ = wr.shape
    Kdim = K * K * Cin
    Cpad = _round_up(2 * Cout, 128)                 # lane-dense packed output width
    in_bytes = jnp.dtype(compute_dtype).itemsize
    out_bytes = in_bytes                            # output stored in compute_dtype

    # --- Generation-aware VMEM budget (64 MiB/TC on v7x, 128 MiB on v5e/v6e). ---
    try:
        vmem_cap = int(getattr(pltpu.get_tpu_info(), "vmem_capacity_bytes",
                               128 * 1024 * 1024))
    except Exception:
        vmem_cap = 128 * 1024 * 1024
    tile_budget = min(24 * 1024 * 1024, int(vmem_cap * 0.30))  # ~19 MiB v7x, 24 MiB v5e/v6e
    vmem_limit = min(64 * 1024 * 1024, int(vmem_cap * 0.75))   # 48 MiB v7x, 64 MiB v5e/v6e

    # --- Contraction tiling: pad Kdim to x16 (zeros are numerically inert); split K
    #     onto its own grid axis only when the resident packed weight would blow the
    #     budget (keeps TM at/above the ~512 HBM-efficiency knee). ---
    # NOTE: weight/bias have constant-per-M index maps but the pipeline still gives
    # them two buffers, so the budget honestly counts x2.
    # TODO(synk): single-buffer weight/bias via pipeline_mode=pl.Buffered(1) once
    # that path is exercised on this JAX pin.
    def _w_bytes(tk):
        return 2 * 2 * tk * Cpad * in_bytes         # two halves x double-buffered

    Kp = _round_up(Kdim, 16)
    nk, TK = 1, Kp
    while _w_bytes(TK) > 0.4 * tile_budget and TK > 512:
        nk += 1
        TK = _round_up(pl.cdiv(Kp, nk), 128)        # x128 so K blocks stay lane-aligned
    Kp = TK * nk

    # --- Patch matrices (host-side im2col in compute_dtype; real and imag planes
    #     stay SEPARATE pallas inputs -> no [Pr|Pi] concat pass through HBM). ---
    # TODO(synk): build the 9 stride-2 taps inside the kernel from a phase-split NHWC
    # slab (manual DMA of row windows) to drop the remaining ~9x im2col read inflation.
    xr = jnp.transpose(jnp.real(x), (0, 2, 3, 1)).astype(compute_dtype)
    xi = jnp.transpose(jnp.imag(x), (0, 2, 3, 1)).astype(compute_dtype)
    pr, Ho, Wo = _im2col(xr, K, stride, pad, Kp)
    pi_, _, _ = _im2col(xi, K, stride, pad, Kp)
    M = N * Ho * Wo

    # --- Packed complex weight halves and fused bias. ---
    # [real | imag] = Pr @ [Wr | Wi] + Pi @ [-Wi | Wr] + [br - bi | br + bi]
    wr_m = jnp.transpose(wr, (2, 3, 1, 0)).reshape(Kdim, Cout).astype(jnp.float32)
    wi_m = jnp.transpose(wi, (2, 3, 1, 0)).reshape(Kdim, Cout).astype(jnp.float32)
    pad_kc = ((0, Kp - Kdim), (0, Cpad - 2 * Cout))
    w_top = jnp.pad(jnp.concatenate([wr_m, wi_m], axis=1), pad_kc).astype(compute_dtype)
    w_bot = jnp.pad(jnp.concatenate([-wi_m, wr_m], axis=1), pad_kc).astype(compute_dtype)
    b_full = jnp.pad(jnp.concatenate([br - bi, br + bi]).astype(jnp.float32),
                     (0, Cpad - 2 * Cout)).reshape(1, Cpad)

    # --- Row tile TM: power of two >= 16 (bf16 sublane packing); halve until the
    #     honestly-counted double-buffered working set fits the budget. ---
    def _budget(tm):
        return (2 * 2 * tm * TK * in_bytes          # pr + pi tiles, double-buffered
                + 2 * tm * Cpad * out_bytes         # output tiles, double-buffered
                + _w_bytes(TK)                      # resident weight halves (x2 bufs)
                + 2 * Cpad * 4                      # fused bias (x2 bufs)
                + tm * Cpad * 4)                    # f32 accumulator scratch

    TM = min(max(16, pl.next_power_of_2(max(int(tile_m), 1))), 2048)
    while TM > 16 and _budget(TM) > tile_budget:
        TM //= 2
    if M < TM:
        TM = _round_up(M, 16)
    grid_m = pl.cdiv(M, TM)                         # partial edge block is masked

    cost = pl.CostEstimate(
        flops=2 * 2 * M * Kp * Cpad,
        transcendentals=0,
        bytes_accessed=(2 * M * Kp * in_bytes
                        + (1 if nk == 1 else grid_m) * 2 * Kp * Cpad * in_bytes
                        + Cpad * 4
                        + M * Cpad * out_bytes))

    out = pl.pallas_call(
        _cdown2_gemm_kernel,
        out_shape=jax.ShapeDtypeStruct((M, Cpad), compute_dtype),
        grid=(grid_m, nk),
        in_specs=[
            pl.BlockSpec((TM, TK), lambda i, k: (i, k)),    # streamed real patches
            pl.BlockSpec((TM, TK), lambda i, k: (i, k)),    # streamed imag patches
            pl.BlockSpec((TK, Cpad), lambda i, k: (k, 0)),  # weight top half [Wr|Wi]
            pl.BlockSpec((TK, Cpad), lambda i, k: (k, 0)),  # weight bottom half [-Wi|Wr]
            pl.BlockSpec((1, Cpad), lambda i, k: (0, 0)),   # fused bias (f32)
        ],
        out_specs=pl.BlockSpec((TM, Cpad), lambda i, k: (i, 0)),
        scratch_shapes=[pltpu.VMEM((TM, Cpad), jnp.float32)],
        compiler_params=pltpu.CompilerParams(
            dimension_semantics=("parallel", "arbitrary"),  # row tiles shard on v7x TCs
            vmem_limit_bytes=vmem_limit,
        ),
        cost_estimate=cost,
    )(pr, pi_, w_top, w_bot, b_full)

    if output_format == "nhwc_packed":
        return out[:, :2 * Cout].reshape(N, Ho, Wo, 2 * Cout)

    outf = out[:, :2 * Cout].astype(jnp.float32)
    out_r = jnp.transpose(outf[:, :Cout].reshape(N, Ho, Wo, Cout), (0, 3, 1, 2))
    out_i = jnp.transpose(outf[:, Cout:].reshape(N, Ho, Wo, Cout), (0, 3, 1, 2))
    return (out_r + 1j * out_i).astype(jnp.complex64)       # NCHW complex64


def _reference(x, wr, wi, br, bi):
    # Pure-JAX reference of ComplexConv2d (complexPyTorch apply_complex semantics).
    def conv(real_in, w, b):
        y = jax.lax.conv_general_dilated(
            real_in, w, window_strides=(2, 2), padding=((1, 1), (1, 1)),
            dimension_numbers=("NCHW", "OIHW", "NCHW"))
        return y + b[None, :, None, None]
    xr, xi = jnp.real(x), jnp.imag(x)
    out_r = conv(xr, wr, br) - conv(xi, wi, bi)
    out_i = conv(xi, wr, br) + conv(xr, wi, bi)
    return (out_r + 1j * out_i).astype(jnp.complex64)


if __name__ == "__main__":
    N, Cin, Cout, H, W = 2, 4, 8, 16, 16
    key = jax.random.PRNGKey(0)
    k1, k2, k3, k4, k5, k6 = jax.random.split(key, 6)

    # Deterministic synthetic parameters (PyTorch Conv2d-style uniform init bounds).
    fan_in = Cin * 3 * 3
    bound = 1.0 / (fan_in ** 0.5)
    xr = jax.random.normal(k1, (N, Cin, H, W), jnp.float32)
    xi = jax.random.normal(k2, (N, Cin, H, W), jnp.float32)
    x = (xr + 1j * xi).astype(jnp.complex64)
    wr = jax.random.uniform(k3, (Cout, Cin, 3, 3), jnp.float32, -bound, bound)
    wi = jax.random.uniform(k4, (Cout, Cin, 3, 3), jnp.float32, -bound, bound)
    br = jax.random.uniform(k5, (Cout,), jnp.float32, -bound, bound)
    bi = jax.random.uniform(k6, (Cout,), jnp.float32, -bound, bound)

    ref = jax.block_until_ready(_reference(x, wr, wi, br, bi))

    # Exact f32-operand path: tight tolerance.
    out_f32 = jax.block_until_ready(
        cdown2_forward(x, wr, wi, br, bi, compute_dtype=jnp.float32))
    assert out_f32.shape == (N, Cout, H // 2, W // 2), out_f32.shape
    assert out_f32.dtype == jnp.complex64, out_f32.dtype
    assert jnp.allclose(jnp.real(out_f32), jnp.real(ref), atol=1e-4, rtol=1e-4)
    assert jnp.allclose(jnp.imag(out_f32), jnp.imag(ref), atol=1e-4, rtol=1e-4)

    # Default bf16-operand path (f32 MXU accumulation, bf16 writeback).
    out_bf16 = jax.block_until_ready(cdown2_forward(x, wr, wi, br, bi))
    assert out_bf16.shape == (N, Cout, H // 2, W // 2), out_bf16.shape
    assert out_bf16.dtype == jnp.complex64, out_bf16.dtype
    assert jnp.allclose(jnp.real(out_bf16), jnp.real(ref), atol=3e-2, rtol=3e-2)
    assert jnp.allclose(jnp.imag(out_bf16), jnp.imag(ref), atol=3e-2, rtol=3e-2)

    # Packed NHWC [real | imag] output (skips the transpose/complex epilogue).
    out_packed = jax.block_until_ready(
        cdown2_forward(x, wr, wi, br, bi, output_format="nhwc_packed"))
    assert out_packed.shape == (N, H // 2, W // 2, 2 * Cout), out_packed.shape
    pk_r = jnp.transpose(out_packed[..., :Cout], (0, 3, 1, 2)).astype(jnp.float32)
    assert jnp.allclose(pk_r, jnp.real(ref), atol=3e-2, rtol=3e-2)

    print("KERNEL_OK")
</pallas_src>

<mosaic_0001>
module attributes {stable_mosaic.version = 11 : i64} {
  func.func @_cdown2_gemm_kernel(%arg0: i32, %arg1: i32, %arg2: memref<128x48xf32, #tpu.memory_space<vmem>>, %arg3: memref<128x48xf32, #tpu.memory_space<vmem>>, %arg4: memref<48x128xf32, #tpu.memory_space<vmem>>, %arg5: memref<48x128xf32, #tpu.memory_space<vmem>>, %arg6: memref<1x128xf32, #tpu.memory_space<vmem>>, %arg7: memref<128x128xf32, #tpu.memory_space<vmem>>, %arg8: memref<128x128xf32, #tpu.memory_space<vmem>>) attributes {dimension_semantics = [#tpu.dimension_semantics<parallel>, #tpu.dimension_semantics<arbitrary>], iteration_bounds = array<i64: 1, 1>, scalar_prefetch = 0 : i64, scratch_operands = 1 : i64, tpu.core_type = #tpu.core_type<tc>, window_params = [{transform_indices = @transform_0, window_bounds = array<i64: 128, 48>}, {transform_indices = @transform_1, window_bounds = array<i64: 128, 48>}, {transform_indices = @transform_2, window_bounds = array<i64: 48, 128>}, {transform_indices = @transform_3, window_bounds = array<i64: 48, 128>}, {pipeline_mode = #tpu.pipeline_mode<synchronous>, transform_indices = @transform_4, window_bounds = array<i64: 1, 128>}, {transform_indices = @transform_5, window_bounds = array<i64: 128, 128>}]} {
    %c0_i32 = arith.constant 0 : i32
    %0 = arith.cmpi eq, %arg1, %c0_i32 : i32
    %1 = arith.extui %0 : i1 to i32
    %c0_i32_0 = arith.constant 0 : i32
    %2 = arith.cmpi ne, %1, %c0_i32_0 : i32
    scf.if %2 {
      %cst_15 = arith.constant 0.000000e+00 : f32
      %16 = vector.broadcast %cst_15 : f32 to vector<128x128xf32>
      %c0_16 = arith.constant 0 : index
      %c0_17 = arith.constant 0 : index
      %17 = vector.load %arg8[%c0_16, %c0_17] : memref<128x128xf32, #tpu.memory_space<vmem>>, vector<128x128xf32>
      tpu.vector_store %arg8[%c0_16, %c0_17], %16 {strides = array<i32>} : memref<128x128xf32, #tpu.memory_space<vmem>>, vector<128x128xf32>,
    } else {
    }
    %c0 = arith.constant 0 : index
    %c0_1 = arith.constant 0 : index
    %3 = vector.load %arg8[%c0, %c0_1] : memref<128x128xf32, #tpu.memory_space<vmem>>, vector<128x128xf32>
    %c0_2 = arith.constant 0 : index
    %c0_3 = arith.constant 0 : index
    %4 = vector.load %arg2[%c0_2, %c0_3] : memref<128x48xf32, #tpu.memory_space<vmem>>, vector<128x48xf32>
    %c0_4 = arith.constant 0 : index
    %c0_5 = arith.constant 0 : index
    %5 = vector.load %arg4[%c0_4, %c0_5] : memref<48x128xf32, #tpu.memory_space<vmem>>, vector<48x128xf32>
    %cst = arith.constant dense<0.000000e+00> : vector<128x128xf32>
    %6 = tpu.matmul %4, %5, %cst {dimension_numbers = #tpu.dot_dimension_numbers<[1], [0], [0], [1], [0, 0, 1, 1], [], []>} : vector<128x48xf32>, vector<48x128xf32>, vector<128x128xf32> -> vector<128x128xf32>
    %c0_6 = arith.constant 0 : index
    %c0_7 = arith.constant 0 : index
    %7 = vector.load %arg3[%c0_6, %c0_7] : memref<128x48xf32, #tpu.memory_space<vmem>>, vector<128x48xf32>
    %c0_8 = arith.constant 0 : index
    %c0_9 = arith.constant 0 : index
    %8 = vector.load %arg5[%c0_8, %c0_9] : memref<48x128xf32, #tpu.memory_space<vmem>>, vector<48x128xf32>
    %cst_10 = arith.constant dense<0.000000e+00> : vector<128x128xf32>
    %9 = tpu.matmul %7, %8, %cst_10 {dimension_numbers = #tpu.dot_dimension_numbers<[1], [0], [0], [1], [0, 0, 1, 1], [], []>} : vector<128x48xf32>, vector<48x128xf32>, vector<128x128xf32> -> vector<128x128xf32>
    %10 = arith.addf %6, %9 : vector<128x128xf32>
    %11 = arith.addf %3, %10 : vector<128x128xf32>
    %c0_11 = arith.constant 0 : index
    %c0_12 = arith.constant 0 : index
    %12 = vector.load %arg8[%c0_11, %c0_12] : memref<128x128xf32, #tpu.memory_space<vmem>>, vector<128x128xf32>
    tpu.vector_store %arg8[%c0_11, %c0_12], %11 {strides = array<i32>} : memref<128x128xf32, #tpu.memory_space<vmem>>, vector<128x128xf32>,
    %c0_i32_13 = arith.constant 0 : i32
    %13 = arith.cmpi eq, %arg1, %c0_i32_13 : i32
    %14 = arith.extui %13 : i1 to i32
    %c0_i32_14 = arith.constant 0 : i32
    %15 = arith.cmpi ne, %14, %c0_i32_14 : i32
    scf.if %15 {
      %c0_15 = arith.constant 0 : index
      %c0_16 = arith.constant 0 : index
      %16 = vector.load %arg8[%c0_15, %c0_16] : memref<128x128xf32, #tpu.memory_space<vmem>>, vector<128x128xf32>
      %c0_17 = arith.constant 0 : index
      %c0_18 = arith.constant 0 : index
      %17 = vector.load %arg6[%c0_17, %c0_18] : memref<1x128xf32, #tpu.memory_space<vmem>>, vector<1x128xf32>
      %18 = vector.broadcast %17 : vector<1x128xf32> to vector<128x128xf32>
      %19 = arith.addf %16, %18 : vector<128x128xf32>
      %c0_19 = arith.constant 0 : index
      %c0_20 = arith.constant 0 : index
      %20 = vector.load %arg7[%c0_19, %c0_20] : memref<128x128xf32, #tpu.memory_space<vmem>>, vector<128x128xf32>
      tpu.vector_store %arg7[%c0_19, %c0_20], %19 {strides = array<i32>} : memref<128x128xf32, #tpu.memory_space<vmem>>, vector<128x128xf32>,
    } else {
    }
    return
  }
  func.func @transform_0(%arg0: i32, %arg1: i32) -> (i32, i32) {
    %c0_i32 = arith.constant 0 : i32
    return %arg0, %arg1 : i32, i32
  }
  func.func @transform_1(%arg0: i32, %arg1: i32) -> (i32, i32) {
    %c0_i32 = arith.constant 0 : i32
    return %arg0, %arg1 : i32, i32
  }
  func.func @transform_2(%arg0: i32, %arg1: i32) -> (i32, i32) {
    %c0_i32 = arith.constant 0 : i32
    %c0_i32_0 = arith.constant 0 : i32
    return %arg1, %c0_i32 : i32, i32
  }
  func.func @transform_3(%arg0: i32, %arg1: i32) -> (i32, i32) {
    %c0_i32 = arith.constant 0 : i32
    %c0_i32_0 = arith.constant 0 : i32
    return %arg1, %c0_i32 : i32, i32
  }
  func.func @transform_4(%arg0: i32, %arg1: i32) -> (i32, i32) {
    %c0_i32 = arith.constant 0 : i32
    %c0_i32_0 = arith.constant 0 : i32
    %c0_i32_1 = arith.constant 0 : i32
    return %c0_i32, %c0_i32_0 : i32, i32
  }
  func.func @transform_5(%arg0: i32, %arg1: i32) -> (i32, i32) {
    %c0_i32 = arith.constant 0 : i32
    %c0_i32_0 = arith.constant 0 : i32
    return %arg0, %c0_i32 : i32, i32
  }
}

</mosaic_0001>

<bundles_post_ra>
// kernel: tpu_custom_call.1
= control target key start
LH: loop header
LB: loop body
LE: loop exit
PB: predicated region body
PF: predicated region fallthrough
CT: control target
= control target key end

     0   :  { %10 = vsyncpa [#allocation4], 0  ;;  %s1189_s0 = inlined_call_operand.hbm [shape: f32[128,48], index: 0, kind: input, shape index: {}]   ;;  %s1190_s1 = inlined_call_operand.hbm [shape: f32[128,48], index: 1, kind: input, shape index: {}]   ;;  %s1191_s2 = inlined_call_operand.hbm [shape: f32[48,128], index: 2, kind: input, shape index: {}]   ;;  %s1192_s3 = inlined_call_operand.hbm [shape: f32[48,128], index: 3, kind: input, shape index: {}]   ;;  %s1193_s4 = inlined_call_operand.hbm [shape: f32[1,128], index: 4, kind: input, shape index: {}]   ;;  %s1194_s5 = inlined_call_operand.hbm [shape: f32[128,128], index: 5, kind: output, shape index: {}]  }
   0x1   :  { %11 = vsyncpa [#allocation7], 0 }
   0x2   :  { %12 = vsyncpa [#allocation10], 0 }
   0x3   :  { %13 = vsyncpa [#allocation5], 0  ;;  %s1000_s18 = smov [#allocation6]   ;;  %s1001_s20 = smov [#allocation9]  }
   0x4   :  { %s31_s19 = sshll.u32 %s1000_s18, 4  ;;  %s55_s21 = sshll.u32 %s1001_s20, 4  ;;  %s32_s19 = int_to_ptr.vmem [resolvable:$true] %s31_s19  ;;  %s1038_s21 = int_to_ptr.vmem [resolvable:$true] %s55_s21 }
   0x5   :  { %s860_s24 = scalar_lea.hbm %s1190_s1, 2048 }
   0x6   :  { %p861_p0 = scmp.ne.s32.totalorder %s1190_s1, %s860_s24  ;;  %p864_p1 = scmp.lt.u32.totalorder %s860_s24, %s1190_s1 }
   0x8   :  { %p866_p2 = pnand %p864_p1, %p861_p0 }
   0xa   :  { %869 = shalt.err (!%p866_p2)
}
   0xb   :  { %s870_s29 = scalar_lea.vmem %s32_s19, 2048  ;;  %p875_p4 = scmp.lt.s32.totalorder %s32_s19, %s32_s19 }
   0xc   :  { %p871_p3 = scmp.ne.s32.totalorder %s32_s19, %s870_s29  ;;  %p876_p5 = scmp.lt.s32.totalorder %s870_s29, %s870_s29 }
   0xe   :  { %p877_p6 = por %p876_p5, %p875_p4 }
  0x10   :  { %p878_p7 = pnand %p877_p6, %p871_p3 }
  0x12   :  { %881 = shalt.err (!%p878_p7)
}
  0x13   :  { %s1002_s30 = smov 128   ;;  %s1003_s6 = smov 8  }
  0x14   :  { %37 = dma.hbm_to_vmem [thread:$0]  %s1190_s1, 2048, %s32_s19, [#allocation7], %s1002_s30, %s1002_s30, %s1003_s6  }
  0x15   :  { %s882_s11 = scalar_lea.hbm %s1192_s3, 768 }
  0x16   :  { %p883_p8 = scmp.ne.s32.totalorder %s1192_s3, %s882_s11  ;;  %p886_p9 = scmp.lt.u32.totalorder %s882_s11, %s1192_s3 }
  0x18   :  { %p888_p10 = pnand %p886_p9, %p883_p8 }
  0x1a   :  { %891 = shalt.err (!%p888_p10)
}
  0x1b   :  { %s892_s16 = scalar_lea.vmem %s1038_s21, 768  ;;  %p897_p12 = scmp.lt.s32.totalorder %s1038_s21, %s1038_s21 }
  0x1c   :  { %p893_p11 = scmp.ne.s32.totalorder %s1038_s21, %s892_s16  ;;  %p898_p13 = scmp.lt.s32.totalorder %s892_s16, %s892_s16 }
  0x1e   :  { %p899_p0 = por %p898_p13, %p897_p12 }
  0x20   :  { %p900_p1 = pnand %p899_p0, %p893_p11 }
  0x22   :  { %903 = shalt.err (!%p900_p1)
}
  0x23   :  { %61 = dma.hbm_to_vmem [thread:$0]  %s1192_s3, 768, %s1038_s21, [#allocation10], %s1002_s30, %s1002_s30, %s1003_s6  }
  0x24   :  { %s1004_s18 = smov [#allocation3]   ;;  %s1005_s20 = smov [#allocation8]  }
  0x25   :  { %s19_s19 = sshll.u32 %s1004_s18, 4  ;;  %s43_s22 = sshll.u32 %s1005_s20, 4  ;;  %s20_s19 = int_to_ptr.vmem [resolvable:$true] %s19_s19  ;;  %s1075_s22 = int_to_ptr.vmem [resolvable:$true] %s43_s22 }
  0x26   :  { %s904_s25 = scalar_lea.hbm %s1189_s0, 2048 }
  0x27   :  { %p905_p2 = scmp.ne.s32.totalorder %s1189_s0, %s904_s25  ;;  %p908_p3 = scmp.lt.u32.totalorder %s904_s25, %s1189_s0 }
  0x29   :  { %p910_p4 = pnand %p908_p3, %p905_p2 }
  0x2b   :  { %913 = shalt.err (!%p910_p4)
}
  0x2c   :  { %s914_s3 = scalar_lea.vmem %s20_s19, 2048  ;;  %p919_p6 = scmp.lt.s32.totalorder %s20_s19, %s20_s19 }
  0x2d   :  { %p915_p5 = scmp.ne.s32.totalorder %s20_s19, %s914_s3  ;;  %p920_p7 = scmp.lt.s32.totalorder %s914_s3, %s914_s3 }
  0x2f   :  { %p921_p8 = por %p920_p7, %p919_p6 }
  0x31   :  { %p922_p9 = pnand %p921_p8, %p915_p5 }
  0x33   :  { %925 = shalt.err (!%p922_p9)
}
  0x34   :  { %25 = dma.hbm_to_vmem [thread:$0]  %s1189_s0, 2048, %s20_s19, [#allocation4], %s1002_s30, %s1002_s30, %s1003_s6  }
  0x35   :  { %s926_s10 = scalar_lea.hbm %s1191_s2, 768 }
  0x36   :  { %p927_p10 = scmp.ne.s32.totalorder %s1191_s2, %s926_s10  ;;  %p930_p11 = scmp.lt.u32.totalorder %s926_s10, %s1191_s2 }
  0x38   :  { %p932_p12 = pnand %p930_p11, %p927_p10 }
  0x3a   :  { %935 = shalt.err (!%p932_p12)
}
  0x3b   :  { %s936_s15 = scalar_lea.vmem %s1075_s22, 768  ;;  %p941_p0 = scmp.lt.s32.totalorder %s1075_s22, %s1075_s22 }
  0x3c   :  { %p937_p13 = scmp.ne.s32.totalorder %s1075_s22, %s936_s15  ;;  %p942_p1 = scmp.lt.s32.totalorder %s936_s15, %s936_s15 }
  0x3e   :  { %p943_p2 = por %p942_p1, %p941_p0 }
  0x40   :  { %p944_p3 = pnand %p943_p2, %p937_p13 }
  0x42   :  { %947 = shalt.err (!%p944_p3)
}
  0x43   :  { %49 = dma.hbm_to_vmem [thread:$0]  %s1191_s2, 768, %s1075_s22, [#allocation7], %s1002_s30, %s1002_s30, %s1003_s6  }
  0x44   :  { %s1006_s1 = smov [#allocation11]   ;;  %s948_s20 = scalar_lea.hbm %s1193_s4, 16 }
  0x45   :  { %s68_s17 = sshll.u32 %s1006_s1, 4  ;;  %p949_p4 = scmp.ne.s32.totalorder %s1193_s4, %s948_s20  ;;  %s69_s17 = int_to_ptr.vmem [resolvable:$true] %s68_s17 }
  0x46   :  { %p952_p5 = scmp.lt.u32.totalorder %s948_s20, %s1193_s4 }
  0x48   :  { %p954_p6 = pnand %p952_p5, %p949_p4 }
  0x4a   :  { %957 = shalt.err (!%p954_p6)
}
  0x4b   :  { %s958_s27 = scalar_lea.vmem %s69_s17, 16  ;;  %s962_s2 = scalar_lea.vmem %s69_s17, 32 }
  0x4c   :  { %p959_p7 = scmp.ne.s32.totalorder %s69_s17, %s958_s27  ;;  %p963_p8 = scmp.lt.s32.totalorder %s69_s17, %s69_s17 }
  0x4d   :  { %p964_p9 = scmp.lt.s32.totalorder %s962_s2, %s958_s27 }
  0x4f   :  { %p965_p10 = por %p964_p9, %p963_p8 }
  0x51   :  { %p966_p11 = pnand %p965_p10, %p959_p7 }
  0x53   :  { %969 = shalt.err (!%p966_p11)
}
  0x54   :  { %71 = dma.hbm_to_vmem [thread:$0]  %s1193_s4, 16, %s69_s17, [#allocation10]  }
  0x55   :  { %992 = dma.done.wait [#allocation4], 2048  }
  0x56   :  { %993 = vsyncadd [#allocation4], 4294965248 }
  0x57   :  { %994 = dma.done.wait [#allocation7], 2816  }
  0x58   :  { %995 = vsyncadd [#allocation7], 4294964480 }
  0x59   :  { %996 = dma.done.wait [#allocation10], 784  }
  0x5a   :  { %997 = vsyncadd [#allocation10], 4294966512  ;;  %v161_v0 = vld [vmem:[#allocation9] sm:$0xff]  ;;  %v162_v1 = vld [vmem:[#allocation9 + $0x8] sm:$0xff]  ;;  %vm167_vm0 = vcmask 392192   ;;  %s1007_s4 = smov [#allocation12]  }
  0x5b   :  { %v139_v2 = vld [vmem:[#allocation8] sm:$0xff]  ;;  %v812_v3 = vpack.c.bf16 %v162_v1, %v161_v0  ;;  %v140_v4 = vld [vmem:[#allocation8 + $0x8] sm:$0xff]  ;;  %v141_v9 = vld [vmem:[#allocation8 + $0x10] sm:$0xff]  ;;  %s649_s29 = sshll.u32 %s1007_s4, 4  ;;  %s650_s29 = int_to_ptr.vmem [resolvable:$true] %s649_s29 }
  0x5c   :  { %v163_v5 = vld [vmem:[#allocation9 + $0x10] sm:$0xff]  ;;  %v164_v6 = vld [vmem:[#allocation9 + $0x18] sm:$0xff]  ;;  %v824_v7 = vpack.c.bf16 %v140_v4, %v139_v2  ;;  %v142_v10 = vld [vmem:[#allocation8 + $0x18] sm:$0xff]  ;;  %s970_s3 = scalar_lea.vmem %s650_s29, 2048  ;;  %p975_p13 = scmp.lt.s32.totalorder %s650_s29, %s650_s29 }
  0x5d   :  { %v816_v8 = vpack.c.bf16 %v164_v6, %v163_v5  ;;  %v165_v11 = vld [vmem:[#allocation9 + $0x20] sm:$0xff]  ;;  %813 = vmatprep.subr.bf16.mxu1 %v812_v3  ;;  %v828_v12 = vpack.c.bf16 %v142_v10, %v141_v9  ;;  %v166_v13 = vld [vmem:[#allocation9 + $0x28] sm:$0xff]  ;;  %v143_v14 = vld [vmem:[#allocation8 + $0x20] sm:$0xff]  ;;  %p971_p12 = scmp.ne.s32.totalorder %s650_s29, %s970_s3  ;;  %p976_p0 = scmp.lt.s32.totalorder %s970_s3, %s970_s3 }
  0x5e   :  { %v144_v15 = vld [vmem:[#allocation8 + $0x28] sm:$0xff]  ;;  %825 = vmatprep.subr.bf16.mxu0 %v824_v7  ;;  %815 = vmatpush3.bf16.msra.mxu1 %v812_v3  ;;  %v145_v16 = vld [vmem:[#allocation6] sm:$0xff]  ;;  %v820_v18 = vpack.c.bf16 %v166_v13, %v165_v11  ;;  %v147_v22 = vld [vmem:[#allocation6 + $0x10] sm:$0xff] }
  0x5f   :  { %v123_v17 = vld [vmem:[#allocation3] sm:$0xff]  ;;  %827 = vmatpush3.bf16.msra.mxu0 %v824_v7  ;;  %817 = vmatprep.subr.bf16.mxu1 %v816_v8  ;;  %v832_v19 = vpack.c.bf16 %v144_v15, %v143_v14  ;;  %v146_v20 = vld [vmem:[#allocation6 + $0x8] sm:$0xff]  ;;  %v125_v23 = vld [vmem:[#allocation3 + $0x10] sm:$0xff]  ;;  %p977_p1 = por %p976_p0, %p975_p13 }
  0x60   :  { %829 = vmatprep.subr.bf16.mxu0 %v828_v12  ;;  %752 = vmatprep.mubr.msk.f32.mxu1 %vm167_vm0, %v145_v16  ;;  %v124_v21 = vld [vmem:[#allocation3 + $0x8] sm:$0xff]  ;;  %v148_v24 = vld [vmem:[#allocation6 + $0x18] sm:$0xff]  ;;  %v149_v26 = vld [vmem:[#allocation6 + $0x20] sm:$0xff] }
  0x61   :  { %788 = vmatprep.mubr.msk.f32.mxu0 %vm167_vm0, %v123_v17  ;;  %v126_v25 = vld [vmem:[#allocation3 + $0x18] sm:$0xff]  ;;  %v127_v27 = vld [vmem:[#allocation3 + $0x20] sm:$0xff]  ;;  %v150_v28 = vld [vmem:[#allocation6 + $0x28] sm:$0xff]  ;;  %p978_p2 = pnand %p977_p1, %p971_p12 }
  0x62   :  { %819 = vmatpush3.bf16.msra.mxu1 %v816_v8  ;;  %v128_v29 = vld [vmem:[#allocation3 + $0x28] sm:$0xff]  ;;  %v151_v30 = vld [vmem:[#allocation6 + $0x30] sm:$0xff]  ;;  %v152_v32 = vld [vmem:[#allocation6 + $0x38] sm:$0xff] }
  0x63   :  { %831 = vmatpush3.bf16.msra.mxu0 %v828_v12  ;;  %821 = vmatprep.subr.bf16.mxu1 %v820_v18  ;;  %v129_v31 = vld [vmem:[#allocation3 + $0x30] sm:$0xff]  ;;  %v130_v33 = vld [vmem:[#allocation3 + $0x38] sm:$0xff]  ;;  %v153_v34 = vld [vmem:[#allocation6 + $0x40] sm:$0xff] }
  0x64   :  { %833 = vmatprep.subr.bf16.mxu0 %v832_v19  ;;  %v131_v35 = vld [vmem:[#allocation3 + $0x40] sm:$0xff]  ;;  %v154_v36 = vld [vmem:[#allocation6 + $0x48] sm:$0xff]  ;;  %v155_v38 = vld [vmem:[#allocation6 + $0x50] sm:$0xff] }
  0x65   :  { %v132_v37 = vld [vmem:[#allocation3 + $0x48] sm:$0xff]  ;;  %v133_v39 = vld [vmem:[#allocation3 + $0x50] sm:$0xff]  ;;  %v156_v40 = vld [vmem:[#allocation6 + $0x58] sm:$0xff] }
  0x66   :  { %823 = vmatpush3.bf16.msra.mxu1 %v820_v18  ;;  %v134_v41 = vld [vmem:[#allocation3 + $0x58] sm:$0xff]  ;;  %v157_v42 = vld [vmem:[#allocation6 + $0x60] sm:$0xff]  ;;  %v158_v44 = vld [vmem:[#allocation6 + $0x68] sm:$0xff] }
  0x67   :  { %835 = vmatpush3.bf16.msra.mxu0 %v832_v19  ;;  %v135_v43 = vld [vmem:[#allocation3 + $0x60] sm:$0xff]  ;;  %v136_v45 = vld [vmem:[#allocation3 + $0x68] sm:$0xff]  ;;  %v159_v46 = vld [vmem:[#allocation6 + $0x70] sm:$0xff] }
  0x68   :  { %v137_v47 = vld [vmem:[#allocation3 + $0x70] sm:$0xff]  ;;  %v160_v48 = vld [vmem:[#allocation6 + $0x78] sm:$0xff]  ;;  %v1156_v52 = vld [vmem:[#allocation11] ss:$0 sm:$0xff] }
  0x69   :  { %753 = vmatmul.mubr.msk.f32.vlgmr.msra.gmra.mrb[0].mxu1 %vm167_vm0, %v146_v20  ;;  %v138_v49 = vld [vmem:[#allocation3 + $0x78] sm:$0xff] }
  0x6a   :  { %789 = vmatmul.mubr.msk.f32.vlgmr.msra.gmra.mrb[0].mxu0 %vm167_vm0, %v124_v21  ;;  %755 = vmatprep.mubr.msk.f32.mxu1 %vm167_vm0, %v147_v22 }
  0x6b   :  { %791 = vmatprep.mubr.msk.f32.mxu0 %vm167_vm0, %v125_v23 }
  0x6d   :  { %756 = vmatmul.mubr.msk.f32.gmra.mrb[2].mxu1 %vm167_vm0, %v148_v24 }
  0x6e   :  { %792 = vmatmul.mubr.msk.f32.gmra.mrb[2].mxu0 %vm167_vm0, %v126_v25  ;;  %758 = vmatprep.mubr.msk.f32.mxu1 %vm167_vm0, %v149_v26 }
  0x6f   :  { %794 = vmatprep.mubr.msk.f32.mxu0 %vm167_vm0, %v127_v27 }
  0x71   :  { %759 = vmatmul.mubr.msk.f32.gmra.mrb[4].mxu1 %vm167_vm0, %v150_v28 }
  0x72   :  { %795 = vmatmul.mubr.msk.f32.gmra.mrb[4].mxu0 %vm167_vm0, %v128_v29  ;;  %761 = vmatprep.mubr.msk.f32.mxu1 %vm167_vm0, %v151_v30 }
  0x73   :  { %797 = vmatprep.mubr.msk.f32.mxu0 %vm167_vm0, %v129_v31 }
  0x75   :  { %762 = vmatmul.mubr.msk.f32.gmra.mrb[6].mxu1 %vm167_vm0, %v152_v32 }
  0x76   :  { %798 = vmatmul.mubr.msk.f32.gmra.mrb[6].mxu0 %vm167_vm0, %v130_v33  ;;  %764 = vmatprep.mubr.msk.f32.mxu1 %vm167_vm0, %v153_v34 }
  0x77   :  { %800 = vmatprep.mubr.msk.f32.mxu0 %vm167_vm0, %v131_v35 }
  0x79   :  { %765 = vmatmul.mubr.msk.f32.gmra.mrb[8].mxu1 %vm167_vm0, %v154_v36 }
  0x7a   :  { %801 = vmatmul.mubr.msk.f32.gmra.mrb[8].mxu0 %vm167_vm0, %v132_v37  ;;  %767 = vmatprep.mubr.msk.f32.mxu1 %vm167_vm0, %v155_v38 }
  0x7b   :  { %803 = vmatprep.mubr.msk.f32.mxu0 %vm167_vm0, %v133_v39 }
  0x7d   :  { %768 = vmatmul.mubr.msk.f32.gmra.mrb[10].mxu1 %vm167_vm0, %v156_v40 }
  0x7e   :  { %804 = vmatmul.mubr.msk.f32.gmra.mrb[10].mxu0 %vm167_vm0, %v134_v41  ;;  %770 = vmatprep.mubr.msk.f32.mxu1 %vm167_vm0, %v157_v42 }
  0x7f   :  { %806 = vmatprep.mubr.msk.f32.mxu0 %vm167_vm0, %v135_v43 }
  0x81   :  { %771 = vmatmul.mubr.msk.f32.gmra.mrb[12].mxu1 %vm167_vm0, %v158_v44 }
  0x82   :  { %807 = vmatmul.mubr.msk.f32.gmra.mrb[12].mxu0 %vm167_vm0, %v136_v45  ;;  %773 = vmatprep.mubr.msk.f32.mxu1 %vm167_vm0, %v159_v46 }
  0x83   :  { %809 = vmatprep.mubr.msk.f32.mxu0 %vm167_vm0, %v137_v47 }
  0x85   :  { %774 = vmatmul.mubr.msk.f32.gmra.mrb[14].mxu1 %vm167_vm0, %v160_v48 }
  0x86   :  { %810 = vmatmul.mubr.msk.f32.gmra.mrb[14].mxu0 %vm167_vm0, %v138_v49 }
 0x13c   :  { %v754_v50 = vpop.f32.mrb[0].mxu1 }
 0x13d   :  { %v790_v51 = vpop.f32.mrb[0].mxu0  ;;  %v282_v53 = vpop.f32.mrb[1].mxu1 }
 0x13e   :  { %v481_v54 = vadd.f32 %v790_v51, %v754_v50  ;;  %v475_v55 = vpop.f32.mrb[1].mxu0 }
 0x13f   :  { %v476_v56 = vadd.f32 %v475_v55, %v282_v53 }
 0x140   :  { %v613_v57 = vadd.f32 %v1156_v52, %v481_v54  ;;  %v757_v58 = vpop.f32.mrb[2].mxu1 }
 0x141   :  { %v612_v59 = vadd.f32 %v1156_v52, %v476_v56  ;;  %v793_v60 = vpop.f32.mrb[2].mxu0  ;;  %v292_v61 = vpop.f32.mrb[3].mxu1 }
 0x142   :  { %629 = vst [vmem:[#allocation12 + $0x8] sm:$0xff] %v613_v57  ;;  %v491_v62 = vadd.f32 %v793_v60, %v757_v58  ;;  %v485_v63 = vpop.f32.mrb[3].mxu0 }
 0x143   :  { %628 = vst [vmem:[#allocation12] sm:$0xff] %v612_v59  ;;  %v486_v0 = vadd.f32 %v485_v63, %v292_v61 }
 0x144   :  { %v615_v1 = vadd.f32 %v1156_v52, %v491_v62  ;;  %v760_v2 = vpop.f32.mrb[4].mxu1 }
 0x145   :  { %v614_v3 = vadd.f32 %v1156_v52, %v486_v0  ;;  %v796_v4 = vpop.f32.mrb[4].mxu0  ;;  %v302_v5 = vpop.f32.mrb[5].mxu1 }
 0x146   :  { %631 = vst [vmem:[#allocation12 + $0x18] sm:$0xff] %v615_v1  ;;  %v501_v6 = vadd.f32 %v796_v4, %v760_v2  ;;  %v495_v7 = vpop.f32.mrb[5].mxu0 }
 0x147   :  { %630 = vst [vmem:[#allocation12 + $0x10] sm:$0xff] %v614_v3  ;;  %v496_v8 = vadd.f32 %v495_v7, %v302_v5 }
 0x148   :  { %v617_v9 = vadd.f32 %v1156_v52, %v501_v6  ;;  %v763_v10 = vpop.f32.mrb[6].mxu1 }
 0x149   :  { %v616_v11 = vadd.f32 %v1156_v52, %v496_v8  ;;  %v799_v12 = vpop.f32.mrb[6].mxu0  ;;  %v312_v13 = vpop.f32.mrb[7].mxu1 }
 0x14a   :  { %633 = vst [vmem:[#allocation12 + $0x28] sm:$0xff] %v617_v9  ;;  %v511_v14 = vadd.f32 %v799_v12, %v763_v10  ;;  %v505_v15 = vpop.f32.mrb[7].mxu0 }
 0x14b   :  { %632 = vst [vmem:[#allocation12 + $0x20] sm:$0xff] %v616_v11  ;;  %v506_v16 = vadd.f32 %v505_v15, %v312_v13 }
 0x14c   :  { %v619_v17 = vadd.f32 %v1156_v52, %v511_v14  ;;  %v766_v18 = vpop.f32.mrb[8].mxu1 }
 0x14d   :  { %v618_v19 = vadd.f32 %v1156_v52, %v506_v16  ;;  %v802_v20 = vpop.f32.mrb[8].mxu0  ;;  %v322_v21 = vpop.f32.mrb[9].mxu1 }
 0x14e   :  { %635 = vst [vmem:[#allocation12 + $0x38] sm:$0xff] %v619_v17  ;;  %v521_v22 = vadd.f32 %v802_v20, %v766_v18  ;;  %v515_v23 = vpop.f32.mrb[9].mxu0 }
 0x14f   :  { %634 = vst [vmem:[#allocation12 + $0x30] sm:$0xff] %v618_v19  ;;  %v516_v24 = vadd.f32 %v515_v23, %v322_v21 }
 0x150   :  { %v621_v25 = vadd.f32 %v1156_v52, %v521_v22  ;;  %v769_v26 = vpop.f32.mrb[10].mxu1 }
 0x151   :  { %v620_v27 = vadd.f32 %v1156_v52, %v516_v24  ;;  %v805_v28 = vpop.f32.mrb[10].mxu0  ;;  %v332_v29 = vpop.f32.mrb[11].mxu1 }
 0x152   :  { %637 = vst [vmem:[#allocation12 + $0x48] sm:$0xff] %v621_v25  ;;  %v531_v30 = vadd.f32 %v805_v28, %v769_v26  ;;  %v525_v31 = vpop.f32.mrb[11].mxu0 }
 0x153   :  { %636 = vst [vmem:[#allocation12 + $0x40] sm:$0xff] %v620_v27  ;;  %v526_v32 = vadd.f32 %v525_v31, %v332_v29 }
 0x154   :  { %v623_v33 = vadd.f32 %v1156_v52, %v531_v30  ;;  %v772_v34 = vpop.f32.mrb[12].mxu1 }
 0x155   :  { %v622_v35 = vadd.f32 %v1156_v52, %v526_v32  ;;  %v808_v36 = vpop.f32.mrb[12].mxu0  ;;  %v342_v37 = vpop.f32.mrb[13].mxu1 }
 0x156   :  { %639 = vst [vmem:[#allocation12 + $0x58] sm:$0xff] %v623_v33  ;;  %v541_v38 = vadd.f32 %v808_v36, %v772_v34  ;;  %v535_v39 = vpop.f32.mrb[13].mxu0 }
 0x157   :  { %638 = vst [vmem:[#allocation12 + $0x50] sm:$0xff] %v622_v35  ;;  %v536_v40 = vadd.f32 %v535_v39, %v342_v37 }
 0x158   :  { %v625_v41 = vadd.f32 %v1156_v52, %v541_v38  ;;  %v775_v42 = vpop.f32.mrb[14].mxu1 }
 0x159   :  { %v624_v43 = vadd.f32 %v1156_v52, %v536_v40  ;;  %v811_v44 = vpop.f32.mrb[14].mxu0  ;;  %v352_v45 = vpop.f32.mrb[15].mxu1 }
 0x15a   :  { %641 = vst [vmem:[#allocation12 + $0x68] sm:$0xff] %v625_v41  ;;  %v551_v46 = vadd.f32 %v811_v44, %v775_v42  ;;  %v545_v47 = vpop.f32.mrb[15].mxu0 }
 0x15b   :  { %640 = vst [vmem:[#allocation12 + $0x60] sm:$0xff] %v624_v43  ;;  %v546_v48 = vadd.f32 %v545_v47, %v352_v45 }
 0x15c   :  { %v627_v49 = vadd.f32 %v1156_v52, %v551_v46 }
 0x15d   :  { %v626_v50 = vadd.f32 %v1156_v52, %v546_v48 }
 0x15e   :  { %643 = vst [vmem:[#allocation12 + $0x78] sm:$0xff] %v627_v49 }
 0x15f   :  { %642 = vst [vmem:[#allocation12 + $0x70] sm:$0xff] %v626_v50 }
 0x160   :  { %981 = shalt.err (!%p978_p2)
}
 0x161   :  { %s982_s8 = scalar_lea.hbm %s1194_s5, 2048 }
 0x162   :  { %p983_p3 = scmp.ne.s32.totalorder %s1194_s5, %s982_s8  ;;  %p986_p4 = scmp.lt.u32.totalorder %s982_s8, %s1194_s5 }
 0x164   :  { %p988_p5 = pnand %p986_p4, %p983_p3 }
 0x166   :  { %991 = shalt.err (!%p988_p5)
}
 0x167   :  { %655 = dma.vmem_to_hbm [thread:$0]  %s650_s29, 2048, %s1194_s5, [#allocation5], %s1002_s30, %s1002_s30, %s1003_s6  }
 0x168   :  { %998 = dma.done.wait [#allocation5], 2048  }
 0x169   :  { %999 = vsyncadd [#allocation5], 4294965248 }
 0x16a   :  { %659 = vsyncpa [#allocation4], 1 }
 0x16b   :  { %660 = vsyncpa [#allocation7], 1 }
 0x16c   :  { %661 = vsyncpa [#allocation10], 1 }
 0x16d   :  { %662 = vsyncpa [#allocation5], 1 }

</bundles_post_ra>
